<compile_context>
chip_gen: v6e
topology: v6e:2x2x1
jax: 0.10.0
libtpu: 0.0.40
codegen_flags: <defaults>
</compile_context>

<pallas_src>
import numpy as np
import jax
import jax.numpy as jnp
from jax import lax
from jax.experimental import pallas as pl
from jax.experimental.pallas import tpu as pltpu


# ---------------------------------------------------------------------------
# Interpolation matrices (PyTorch bilinear, align_corners=False).
# ---------------------------------------------------------------------------

def _interp_matrix_np(out_size: int, in_size: int) -> np.ndarray:
    """Row-interpolation matrix matching PyTorch bilinear, align_corners=False."""
    scale = in_size / out_size
    dst = np.arange(out_size, dtype=np.float64)
    src = (dst + 0.5) * scale - 0.5
    src = np.maximum(src, 0.0)                      # PyTorch clamps negative src to 0
    i0 = np.minimum(np.floor(src).astype(np.int64), in_size - 1)
    i1 = np.minimum(i0 + 1, in_size - 1)
    w1 = src - i0
    w0 = 1.0 - w1
    m = np.zeros((out_size, in_size), dtype=np.float64)
    rows = np.arange(out_size)
    np.add.at(m, (rows, i0), w0)
    np.add.at(m, (rows, i1), w1)
    return m


def _is_pow2(n: int) -> bool:
    return n >= 1 and (n & (n - 1)) == 0


def _matrix_dtype(x_dtype, scale: int):
    # bf16 interpolation weights are exact only for power-of-two scales
    # (weights are multiples of 1/(2*scale)); feed the native bf16 MXU path then.
    if x_dtype == jnp.bfloat16 and _is_pow2(scale):
        return jnp.bfloat16
    return jnp.float32


# ---------------------------------------------------------------------------
# VMEM sizing / plane-batching heuristics.
# ---------------------------------------------------------------------------

def _vmem_budget_bytes() -> int:
    """Per-core VMEM budget: ~75% of physical (≈48 MiB on v7x, ≈96 MiB on v5e/v6e)."""
    try:
        cap = int(pltpu.get_tpu_info().vmem_capacity_bytes)
    except Exception:
        cap = 64 * 1024 * 1024          # conservative fallback (v7x-sized VMEM)
    return (cap * 3) // 4


_MULTI_STEP_BYTES = 4 * 1024 * 1024     # only split the grid when >= this much data moves


def _choose_rows(nc, plane_in_bytes, plane_out_bytes, const_bytes, budget_bytes,
                 extra_plane_bytes=0, align=1):
    """Number of (n, c) planes processed per grid step.

    * Fits double-buffered input/output blocks plus single-buffered per-plane
      scratch and the VMEM-resident interpolation matrices into the budget.
    * Uses a single grid step when the whole problem fits and is small: the
      per-step (~0.35 us) overhead dominates on single-TensorCore v5e/v6e.
    * Splits into >= 2 steps only when enough bytes move that v7x's two
      TensorCores benefit from sharing the "parallel" axis.
    """
    per_plane = 2 * (plane_in_bytes + plane_out_bytes) + extra_plane_bytes
    avail = max(budget_bytes - const_bytes, per_plane)
    rows = max(1, int(avail // per_plane))
    if nc >= 2 and nc * (plane_in_bytes + plane_out_bytes) >= _MULTI_STEP_BYTES:
        rows = min(rows, -(-nc // 2))       # >= 2 steps only for large problems
    rows = int(min(rows, nc))
    if rows < nc and align > 1:
        rows = max(align, (rows // align) * align)
    return rows


# ---------------------------------------------------------------------------
# Path A: small spatial planes (Wo < 128) — single Kronecker matmul,
#         lane-dense input and output slabs, one MXU contraction per block.
# ---------------------------------------------------------------------------

def _resize_kron_kernel(kt_ref, x_ref, o_ref):
    # kt_ref: (H*W, Ho*Wo)  transposed kron(Rh, Rw) interp matrix (VMEM resident)
    # x_ref:  (TM, H*W)     TM flattened input planes (lane-dense loads)
    # o_ref:  (TM, Ho*Wo)   TM flattened output planes (lane-dense, unmasked stores)
    x = x_ref[...].astype(kt_ref.dtype)            # no-op when dtypes already match
    o_ref[...] = jnp.dot(x, kt_ref[...],
                         preferred_element_type=jnp.float32).astype(o_ref.dtype)


def _upsample_kron(x: jax.Array, scale: int) -> jax.Array:
    N, C, H, W = x.shape
    Ho, Wo = H * scale, W * scale
    nc = N * C
    mdt = _matrix_dtype(x.dtype, scale)
    rh = _interp_matrix_np(Ho, H)                        # (Ho, H)
    rw = _interp_matrix_np(Wo, W)                        # (Wo, W)
    kt = jnp.asarray(np.kron(rh, rw).T, mdt)             # (H*W, Ho*Wo)
    xf = x.reshape(nc, H * W)

    ebytes = x.dtype.itemsize
    kt_bytes = kt.size * np.dtype(mdt).itemsize
    budget = _vmem_budget_bytes()
    tm = _choose_rows(nc, H * W * ebytes, Ho * Wo * ebytes,
                      const_bytes=2 * kt_bytes, budget_bytes=budget, align=8)
    grid = (pl.cdiv(nc, tm),)
    cost = pl.CostEstimate(
        flops=2 * nc * (H * W) * (Ho * Wo),
        transcendentals=0,
        bytes_accessed=nc * (H * W + Ho * Wo) * ebytes + kt_bytes)

    out = pl.pallas_call(
        _resize_kron_kernel,
        out_shape=jax.ShapeDtypeStruct((nc, Ho * Wo), x.dtype),
        grid=grid,
        in_specs=[
            # Constant index_map => DMA'd once, stays VMEM-resident across steps.
            pl.BlockSpec((H * W, Ho * Wo), lambda i: (0, 0)),
            pl.BlockSpec((tm, H * W), lambda i: (i, 0)),
        ],
        out_specs=pl.BlockSpec((tm, Ho * Wo), lambda i: (i, 0)),
        compiler_params=pltpu.CompilerParams(
            dimension_semantics=("parallel",), vmem_limit_bytes=budget),
        cost_estimate=cost,
    )(kt, xf)
    return out.reshape(N, C, Ho, Wo)


# ---------------------------------------------------------------------------
# Path B: large spatial planes — separable Rh (per plane, small) then one
#         fused lane-dense (TC*Ho, W) @ (W, Wo) matmul straight to the output.
# ---------------------------------------------------------------------------

def _resize_separable_kernel(rh_ref, rwt_ref, x_ref, o_ref, z_ref):
    # rh_ref:  (Ho, H)        row interpolation matrix (VMEM resident)
    # rwt_ref: (W, Wo)        column interpolation matrix, pre-transposed
    # x_ref:   (TC, H, W)     TC input planes
    # o_ref:   (TC, Ho, Wo)   TC output planes
    # z_ref:   (TC*Ho, W)     VMEM scratch holding the Rh-interpolated planes
    tc, h, w = x_ref.shape
    _, ho, wo = o_ref.shape
    rh = rh_ref[...]

    def h_interp(b, carry):
        # Per-plane H-interpolation on the RAW (H, W) input (N = W, not Wo):
        # `scale`x less serialized MXU work than interpolating W first.
        z_ref[pl.ds(b * ho, ho), :] = jnp.dot(
            rh, x_ref[b].astype(rh.dtype),
            preferred_element_type=jnp.float32).astype(z_ref.dtype)
        return carry

    lax.fori_loop(0, tc, h_interp, 0, unroll=(tc <= 16))

    # One fused, lane-dense W-interpolation over all planes; result is the
    # final output (unmasked stores straight from the matmul).
    out = jnp.dot(z_ref[...], rwt_ref[...], preferred_element_type=jnp.float32)
    o_ref[...] = out.reshape(tc, ho, wo).astype(o_ref.dtype)


def _upsample_separable(x: jax.Array, scale: int) -> jax.Array:
    N, C, H, W = x.shape
    Ho, Wo = H * scale, W * scale
    nc = N * C
    mdt = _matrix_dtype(x.dtype, scale)
    rh = jnp.asarray(_interp_matrix_np(Ho, H), mdt)       # (Ho, H)
    rwt = jnp.asarray(_interp_matrix_np(Wo, W).T, mdt)    # (W, Wo)
    xf = x.reshape(nc, H, W)

    ebytes = x.dtype.itemsize
    mbytes = np.dtype(mdt).itemsize
    const_bytes = 2 * (rh.size + rwt.size) * mbytes       # double-buffered constants
    budget = _vmem_budget_bytes()
    # tc may legally be 1..7: the (8,128) constraint applies to the last two
    # block dims (H, W / Ho, Wo), which are full-extent here.
    tc = _choose_rows(nc, H * W * ebytes, Ho * Wo * ebytes,
                      const_bytes=const_bytes, budget_bytes=budget,
                      extra_plane_bytes=Ho * W * mbytes, align=1)
    grid = (pl.cdiv(nc, tc),)
    cost = pl.CostEstimate(
        flops=2 * nc * (Ho * H * W + Ho * W * Wo),
        transcendentals=0,
        bytes_accessed=nc * (H * W + Ho * Wo) * ebytes + (rh.size + rwt.size) * mbytes)

    out = pl.pallas_call(
        _resize_separable_kernel,
        out_shape=jax.ShapeDtypeStruct((nc, Ho, Wo), x.dtype),
        grid=grid,
        in_specs=[
            pl.BlockSpec((Ho, H), lambda i: (0, 0)),
            pl.BlockSpec((W, Wo), lambda i: (0, 0)),
            pl.BlockSpec((tc, H, W), lambda i: (i, 0, 0)),
        ],
        out_specs=pl.BlockSpec((tc, Ho, Wo), lambda i: (i, 0, 0)),
        scratch_shapes=[pltpu.VMEM((tc * Ho, W), mdt)],
        compiler_params=pltpu.CompilerParams(
            dimension_semantics=("parallel",), vmem_limit_bytes=budget),
        cost_estimate=cost,
    )(rh, rwt, xf)
    return out.reshape(N, C, Ho, Wo)


# ---------------------------------------------------------------------------
# Public entry points.
# ---------------------------------------------------------------------------

_KRON_MAX_BYTES = 2 * 1024 * 1024     # max VMEM-resident kron(Rh, Rw) size
_KRON_MIN_AMORT_BYTES = 1 * 1024 * 1024


def bilinear_upsample(x: jax.Array, scale: int) -> jax.Array:
    """x: (N, C, H, W) -> (N, C, H*scale, W*scale), PyTorch bilinear, align_corners=False."""
    N, C, H, W = x.shape
    Ho, Wo = H * scale, W * scale
    nc = N * C
    mdt = _matrix_dtype(x.dtype, scale)
    kt_bytes = H * W * Ho * Wo * np.dtype(mdt).itemsize
    out_bytes = nc * Ho * Wo * x.dtype.itemsize
    # Kron path only in the masked-store regime (Wo < 128) and when the kron
    # matrix fits VMEM and its traffic is amortized (or the problem is tiny and
    # launch-overhead dominated anyway).
    use_kron = (Wo < 128
                and kt_bytes <= _KRON_MAX_BYTES
                and kt_bytes <= max(out_bytes, _KRON_MIN_AMORT_BYTES))
    if use_kron:
        return _upsample_kron(x, scale)
    return _upsample_separable(x, scale)


def segformer_adapter(xs, out_layers=(3,), scales=(4,)):
    """Pallas implementation of SegFormerAdapter.forward (xs: list of NCHW arrays)."""
    outs = []
    for i, s in zip(out_layers, scales):
        if s == 1:
            outs.append(xs[i])
        else:
            outs.append(bilinear_upsample(xs[i], s))
    return jnp.concatenate(outs, axis=1)


if __name__ == "__main__":
    key = jax.random.PRNGKey(0)
    k0, k1, k2, k3 = jax.random.split(key, 4)
    # Small SegFormer-like 4-stage feature pyramid (NCHW). Only x[3] is consumed
    # by the default config (out_layers=[3], scales=[4]).
    xs = [
        jax.random.normal(k0, (2, 1, 64, 64), jnp.float32),
        jax.random.normal(k1, (2, 2, 32, 32), jnp.float32),
        jax.random.normal(k2, (2, 4, 16, 16), jnp.float32),
        jax.random.normal(k3, (2, 8, 8, 8), jnp.float32),
    ]

    out = jax.block_until_ready(segformer_adapter(xs))
    assert out.shape == (2, 8, 32, 32), out.shape

    # Reference: bilinear upsample with half-pixel centers (same as PyTorch
    # align_corners=False for upsampling).
    ref = jax.image.resize(xs[3], (2, 8, 32, 32), method="bilinear")
    np.testing.assert_allclose(np.asarray(out), np.asarray(ref), rtol=1e-4, atol=1e-4)

    # Also exercise the separable (large-spatial) kernel path on the same input.
    out_sep = jax.block_until_ready(_upsample_separable(xs[3], 4))
    np.testing.assert_allclose(np.asarray(out_sep), np.asarray(ref), rtol=1e-4, atol=1e-4)

    # bf16 production path (native bf16 MXU feeding, bf16 interp matrices).
    xb = xs[3].astype(jnp.bfloat16)
    out_bf16 = jax.block_until_ready(bilinear_upsample(xb, 4))
    assert out_bf16.shape == (2, 8, 32, 32) and out_bf16.dtype == jnp.bfloat16
    ref_bf16 = jax.image.resize(xb.astype(jnp.float32), (2, 8, 32, 32), method="bilinear")
    np.testing.assert_allclose(np.asarray(out_bf16.astype(jnp.float32)),
                               np.asarray(ref_bf16), rtol=0.0, atol=5e-2)

    print("KERNEL_OK")
</pallas_src>

<mosaic_0001>
module attributes {stable_mosaic.version = 11 : i64} {
  func.func @_resize_kron_kernel(%arg0: i32, %arg1: memref<64x1024xf32, #tpu.memory_space<vmem>>, %arg2: memref<16x64xf32, #tpu.memory_space<vmem>>, %arg3: memref<16x1024xf32, #tpu.memory_space<vmem>>) attributes {dimension_semantics = [#tpu.dimension_semantics<parallel>], iteration_bounds = array<i64: 1>, scalar_prefetch = 0 : i64, scratch_operands = 0 : i64, tpu.core_type = #tpu.core_type<tc>, window_params = [{pipeline_mode = #tpu.pipeline_mode<synchronous>, transform_indices = @transform_0, window_bounds = array<i64: 64, 1024>}, {transform_indices = @transform_1, window_bounds = array<i64: 16, 64>}, {transform_indices = @transform_2, window_bounds = array<i64: 16, 1024>}]} {
    %c0 = arith.constant 0 : index
    %c0_0 = arith.constant 0 : index
    %0 = vector.load %arg2[%c0, %c0_0] : memref<16x64xf32, #tpu.memory_space<vmem>>, vector<16x64xf32>
    %c0_1 = arith.constant 0 : index
    %c0_2 = arith.constant 0 : index
    %1 = vector.load %arg1[%c0_1, %c0_2] : memref<64x1024xf32, #tpu.memory_space<vmem>>, vector<64x1024xf32>
    %cst = arith.constant dense<0.000000e+00> : vector<16x1024xf32>
    %2 = tpu.matmul %0, %1, %cst {dimension_numbers = #tpu.dot_dimension_numbers<[1], [0], [0], [1], [0, 0, 1, 1], [], []>} : vector<16x64xf32>, vector<64x1024xf32>, vector<16x1024xf32> -> vector<16x1024xf32>
    %c0_3 = arith.constant 0 : index
    %c0_4 = arith.constant 0 : index
    %3 = vector.load %arg3[%c0_3, %c0_4] : memref<16x1024xf32, #tpu.memory_space<vmem>>, vector<16x1024xf32>
    tpu.vector_store %arg3[%c0_3, %c0_4], %2 {strides = array<i32>} : memref<16x1024xf32, #tpu.memory_space<vmem>>, vector<16x1024xf32>,
    return
  }
  func.func @transform_0(%arg0: i32) -> (i32, i32) {
    %c0_i32 = arith.constant 0 : i32
    %c0_i32_0 = arith.constant 0 : i32
    %c0_i32_1 = arith.constant 0 : i32
    return %c0_i32, %c0_i32_0 : i32, i32
  }
  func.func @transform_1(%arg0: i32) -> (i32, i32) {
    %c0_i32 = arith.constant 0 : i32
    %c0_i32_0 = arith.constant 0 : i32
    return %arg0, %c0_i32 : i32, i32
  }
  func.func @transform_2(%arg0: i32) -> (i32, i32) {
    %c0_i32 = arith.constant 0 : i32
    %c0_i32_0 = arith.constant 0 : i32
    return %arg0, %c0_i32 : i32, i32
  }
}

</mosaic_0001>

<bundles_post_ra>
// kernel: tpu_custom_call.1
= control target key start
LH: loop header
LB: loop body
LE: loop exit
PB: predicated region body
PF: predicated region fallthrough
CT: control target
= control target key end

     0   :  { %7 = vsyncpa [#allocation3], 0  ;;  %s597_s0 = inlined_call_operand.hbm [shape: f32[64,1024], index: 0, kind: input, shape index: {}]   ;;  %s598_s1 = inlined_call_operand.hbm [shape: f32[16,64], index: 1, kind: input, shape index: {}]   ;;  %s599_s2 = inlined_call_operand.hbm [shape: f32[16,1024], index: 2, kind: output, shape index: {}]  }
   0x1   :  { %8 = vsyncpa [#allocation6], 0 }
   0x2   :  { %9 = vsyncpa [#allocation4], 0  ;;  %s537_s9 = smov [#allocation2]  }
   0x3   :  { %s15_s10 = sshll.u32 %s537_s9, 4  ;;  %s16_s10 = int_to_ptr.vmem [resolvable:$true] %s15_s10 }
   0x4   :  { %s479_s11 = scalar_lea.vmem %s16_s10, 8192  ;;  %p484_p1 = scmp.lt.s32.totalorder %s16_s10, %s16_s10 }
   0x5   :  { %p480_p0 = scmp.ne.s32.totalorder %s16_s10, %s479_s11  ;;  %p485_p2 = scmp.lt.s32.totalorder %s479_s11, %s479_s11 }
   0x7   :  { %p486_p3 = por %p485_p2, %p484_p1 }
   0x9   :  { %p487_p4 = pnand %p486_p3, %p480_p0 }
   0xb   :  { %490 = shalt.err (!%p487_p4)
}
   0xc   :  { %s538_s12 = smov 1024   ;;  %s539_s13 = smov 64  }
   0xd   :  { %21 = dma.hbm_to_vmem [thread:$0]  %s597_s0, 8192, %s16_s10, [#allocation3], %s538_s12, %s538_s12, %s539_s13  }
   0xe   :  { %s540_s16 = smov [#allocation5]  }
   0xf   :  { %s27_s17 = sshll.u32 %s540_s16, 4  ;;  %s28_s17 = int_to_ptr.vmem [resolvable:$true] %s27_s17 }
  0x10   :  { %s499_s18 = scalar_lea.vmem %s28_s17, 256  ;;  %p504_p6 = scmp.lt.s32.totalorder %s28_s17, %s28_s17 }
  0x11   :  { %p500_p5 = scmp.ne.s32.totalorder %s28_s17, %s499_s18  ;;  %p505_p7 = scmp.lt.s32.totalorder %s499_s18, %s499_s18 }
  0x13   :  { %p506_p8 = por %p505_p7, %p504_p6 }
  0x15   :  { %p507_p9 = pnand %p506_p8, %p500_p5 }
  0x17   :  { %510 = shalt.err (!%p507_p9)
}
  0x18   :  { %s541_s19 = smov 128   ;;  %s542_s20 = smov 8  }
  0x19   :  { %33 = dma.hbm_to_vmem [thread:$0]  %s598_s1, 256, %s28_s17, [#allocation6], %s541_s19, %s541_s19, %s542_s20  }
  0x1a   :  { %531 = dma.done.wait [#allocation3], 8192  }
  0x1b   :  { %532 = vsyncadd [#allocation3], 4294959104 }
  0x1c   :  { %533 = dma.done.wait [#allocation6], 256  }
  0x1d   :  { %534 = vsyncadd [#allocation6], 4294967040  ;;  %v543_v0 = vmov 0.0   ;;  %v99_v1 = vld [vmem:[#allocation2 + $0x1c8] sm:$0xff]  ;;  %v101_v2 = vld [vmem:[#allocation2 + $0x1d8] sm:$0xff]  ;;  %vm106_vm0 = vcmask 523264  }
  0x1e   :  { %177 = vmatprep.mubr.f32.mxu0 %v543_v0  ;;  %254 = vmatprep.mubr.f32.mxu1 %v543_v0  ;;  %v98_v3 = vld [vmem:[#allocation2 + $0x1c0] sm:$0xff]  ;;  %v100_v4 = vld [vmem:[#allocation2 + $0x1d0] sm:$0xff]  ;;  %v91_v5 = vld [vmem:[#allocation2 + $0x188] sm:$0xff]  ;;  %s544_s0 = smov [#allocation7]  }
  0x1f   :  { %129 = vmatprep.subr.mxu0 %v99_v1  ;;  %206 = vmatprep.subr.mxu1 %v101_v2  ;;  %v93_v6 = vld [vmem:[#allocation2 + $0x198] sm:$0xff]  ;;  %v90_v7 = vld [vmem:[#allocation2 + $0x180] sm:$0xff]  ;;  %v92_v8 = vld [vmem:[#allocation2 + $0x190] sm:$0xff]  ;;  %s442_s1 = sshll.u32 %s544_s0, 4  ;;  %s443_s1 = int_to_ptr.vmem [resolvable:$true] %s442_s1 }
  0x20   :  { %130 = vmatpush1.msra.mxu0 %v98_v3  ;;  %207 = vmatpush1.msra.mxu1 %v100_v4  ;;  %v83_v9 = vld [vmem:[#allocation2 + $0x148] sm:$0xff]  ;;  %v85_v10 = vld [vmem:[#allocation2 + $0x158] sm:$0xff]  ;;  %v82_v11 = vld [vmem:[#allocation2 + $0x140] sm:$0xff]  ;;  %s511_s23 = scalar_lea.vmem %s443_s1, 2048  ;;  %p516_p11 = scmp.lt.s32.totalorder %s443_s1, %s443_s1 }
  0x21   :  { %131 = vmatprep.subr.mxu0 %v91_v5  ;;  %208 = vmatprep.subr.mxu1 %v93_v6  ;;  %v84_v12 = vld [vmem:[#allocation2 + $0x150] sm:$0xff]  ;;  %v75_v13 = vld [vmem:[#allocation2 + $0x108] sm:$0xff]  ;;  %v77_v14 = vld [vmem:[#allocation2 + $0x118] sm:$0xff]  ;;  %p512_p10 = scmp.ne.s32.totalorder %s443_s1, %s511_s23  ;;  %p517_p12 = scmp.lt.s32.totalorder %s511_s23, %s511_s23 }
  0x22   :  { %132 = vmatpush1.msra.mxu0 %v90_v7  ;;  %209 = vmatpush1.msra.mxu1 %v92_v8  ;;  %v74_v15 = vld [vmem:[#allocation2 + $0x100] sm:$0xff]  ;;  %v76_v16 = vld [vmem:[#allocation2 + $0x110] sm:$0xff]  ;;  %v67_v17 = vld [vmem:[#allocation2 + $0xc8] sm:$0xff] }
  0x23   :  { %133 = vmatprep.subr.mxu0 %v83_v9  ;;  %210 = vmatprep.subr.mxu1 %v85_v10  ;;  %v69_v18 = vld [vmem:[#allocation2 + $0xd8] sm:$0xff]  ;;  %v66_v19 = vld [vmem:[#allocation2 + $0xc0] sm:$0xff]  ;;  %v68_v20 = vld [vmem:[#allocation2 + $0xd0] sm:$0xff]  ;;  %p518_p13 = por %p517_p12, %p516_p11 }
  0x24   :  { %134 = vmatpush1.msra.mxu0 %v82_v11  ;;  %211 = vmatpush1.msra.mxu1 %v84_v12  ;;  %v59_v21 = vld [vmem:[#allocation2 + $0x88] sm:$0xff]  ;;  %v61_v22 = vld [vmem:[#allocation2 + $0x98] sm:$0xff]  ;;  %v58_v23 = vld [vmem:[#allocation2 + $0x80] sm:$0xff] }
  0x25   :  { %135 = vmatprep.subr.mxu0 %v75_v13  ;;  %212 = vmatprep.subr.mxu1 %v77_v14  ;;  %v60_v24 = vld [vmem:[#allocation2 + $0x90] sm:$0xff]  ;;  %v51_v25 = vld [vmem:[#allocation2 + $0x48] sm:$0xff]  ;;  %v53_v26 = vld [vmem:[#allocation2 + $0x58] sm:$0xff]  ;;  %p519_p0 = pnand %p518_p13, %p512_p10 }
  0x26   :  { %136 = vmatpush1.msra.mxu0 %v74_v15  ;;  %213 = vmatpush1.msra.mxu1 %v76_v16  ;;  %v50_v27 = vld [vmem:[#allocation2 + $0x40] sm:$0xff]  ;;  %v52_v28 = vld [vmem:[#allocation2 + $0x50] sm:$0xff]  ;;  %v43_v29 = vld [vmem:[#allocation2 + $0x8] sm:$0xff] }
  0x27   :  { %137 = vmatprep.subr.mxu0 %v67_v17  ;;  %214 = vmatprep.subr.mxu1 %v69_v18  ;;  %v45_v30 = vld [vmem:[#allocation2 + $0x18] sm:$0xff]  ;;  %v42_v31 = vld [vmem:[#allocation2] sm:$0xff]  ;;  %v44_v32 = vld [vmem:[#allocation2 + $0x10] sm:$0xff] }
  0x28   :  { %138 = vmatpush1.msra.mxu0 %v66_v19  ;;  %215 = vmatpush1.msra.mxu1 %v68_v20  ;;  %v571_v33 = vld [vmem:[#allocation5] sm:$0xff]  ;;  %v103_v34 = vld [vmem:[#allocation2 + $0x1e8] sm:$0xff]  ;;  %v105_v35 = vld [vmem:[#allocation2 + $0x1f8] sm:$0xff] }
  0x29   :  { %139 = vmatprep.subr.mxu0 %v59_v21  ;;  %216 = vmatprep.subr.mxu1 %v61_v22  ;;  %v102_v36 = vld [vmem:[#allocation2 + $0x1e0] sm:$0xff]  ;;  %v104_v37 = vld [vmem:[#allocation2 + $0x1f0] sm:$0xff]  ;;  %v95_v38 = vld [vmem:[#allocation2 + $0x1a8] sm:$0xff] }
  0x2a   :  { %140 = vmatpush1.msra.mxu0 %v58_v23  ;;  %217 = vmatpush1.msra.mxu1 %v60_v24  ;;  %v97_v39 = vld [vmem:[#allocation2 + $0x1b8] sm:$0xff]  ;;  %v94_v40 = vld [vmem:[#allocation2 + $0x1a0] sm:$0xff]  ;;  %v96_v41 = vld [vmem:[#allocation2 + $0x1b0] sm:$0xff] }
  0x2b   :  { %141 = vmatprep.subr.mxu0 %v51_v25  ;;  %218 = vmatprep.subr.mxu1 %v53_v26  ;;  %v87_v42 = vld [vmem:[#allocation2 + $0x168] sm:$0xff]  ;;  %v89_v43 = vld [vmem:[#allocation2 + $0x178] sm:$0xff]  ;;  %v86_v44 = vld [vmem:[#allocation2 + $0x160] sm:$0xff] }
  0x2c   :  { %142 = vmatpush1.msra.mxu0 %v50_v27  ;;  %219 = vmatpush1.msra.mxu1 %v52_v28  ;;  %v88_v45 = vld [vmem:[#allocation2 + $0x170] sm:$0xff]  ;;  %v79_v46 = vld [vmem:[#allocation2 + $0x128] sm:$0xff]  ;;  %v81_v47 = vld [vmem:[#allocation2 + $0x138] sm:$0xff] }
  0x2d   :  { %143 = vmatprep.subr.mxu0 %v43_v29  ;;  %220 = vmatprep.subr.mxu1 %v45_v30  ;;  %v78_v48 = vld [vmem:[#allocation2 + $0x120] sm:$0xff]  ;;  %v80_v49 = vld [vmem:[#allocation2 + $0x130] sm:$0xff]  ;;  %v71_v50 = vld [vmem:[#allocation2 + $0xe8] sm:$0xff] }
  0x2e   :  { %144 = vmatpush1.msra.mxu0 %v42_v31  ;;  %221 = vmatpush1.msra.mxu1 %v44_v32  ;;  %v73_v51 = vld [vmem:[#allocation2 + $0xf8] sm:$0xff]  ;;  %v70_v52 = vld [vmem:[#allocation2 + $0xe0] sm:$0xff]  ;;  %v72_v53 = vld [vmem:[#allocation2 + $0xf0] sm:$0xff] }
  0x2f   :  { %455 = vmatmul.mubr.msk.f32.vlgmr.msra.gmra.mxu0 %vm106_vm0, %v571_v33  ;;  %457 = vmatmul.mubr.msk.f32.vlgmr.msra.gmra.mxu1 %vm106_vm0, %v571_v33  ;;  %v41_v54 = vld [vmem:[#allocation5 + $0x8] sm:$0xff]  ;;  %v65_v56 = vld [vmem:[#allocation2 + $0xb8] sm:$0xff]  ;;  %v62_v57 = vld [vmem:[#allocation2 + $0xa0] sm:$0xff] }
  0x30   :  { %283 = vmatprep.subr.mxu0 %v103_v34  ;;  %360 = vmatprep.subr.mxu1 %v105_v35  ;;  %v63_v55 = vld [vmem:[#allocation2 + $0xa8] sm:$0xff]  ;;  %v64_v58 = vld [vmem:[#allocation2 + $0xb0] sm:$0xff]  ;;  %v57_v60 = vld [vmem:[#allocation2 + $0x78] sm:$0xff] }
  0x31   :  { %284 = vmatpush1.msra.mxu0 %v102_v36  ;;  %361 = vmatpush1.msra.mxu1 %v104_v37  ;;  %v55_v59 = vld [vmem:[#allocation2 + $0x68] sm:$0xff]  ;;  %v54_v61 = vld [vmem:[#allocation2 + $0x60] sm:$0xff]  ;;  %v56_v62 = vld [vmem:[#allocation2 + $0x70] sm:$0xff] }
  0x32   :  { %285 = vmatprep.subr.mxu0 %v95_v38  ;;  %362 = vmatprep.subr.mxu1 %v97_v39  ;;  %v47_v63 = vld [vmem:[#allocation2 + $0x28] sm:$0xff]  ;;  %v49_v1 = vld [vmem:[#allocation2 + $0x38] sm:$0xff]  ;;  %v46_v2 = vld [vmem:[#allocation2 + $0x20] sm:$0xff] }
  0x33   :  { %286 = vmatpush1.msra.mxu0 %v94_v40  ;;  %363 = vmatpush1.msra.mxu1 %v96_v41  ;;  %v48_v3 = vld [vmem:[#allocation2 + $0x30] sm:$0xff] }
  0x34   :  { %287 = vmatprep.subr.mxu0 %v87_v42  ;;  %364 = vmatprep.subr.mxu1 %v89_v43 }
  0x35   :  { %288 = vmatpush1.msra.mxu0 %v86_v44  ;;  %365 = vmatpush1.msra.mxu1 %v88_v45 }
  0x36   :  { %289 = vmatprep.subr.mxu0 %v79_v46  ;;  %366 = vmatprep.subr.mxu1 %v81_v47 }
  0x37   :  { %290 = vmatpush1.msra.mxu0 %v78_v48  ;;  %367 = vmatpush1.msra.mxu1 %v80_v49 }
  0x38   :  { %291 = vmatprep.subr.mxu0 %v71_v50  ;;  %368 = vmatprep.subr.mxu1 %v73_v51 }
  0x39   :  { %183 = vmatprep.mubr.f32.mxu0 %v543_v0  ;;  %260 = vmatprep.mubr.f32.mxu1 %v543_v0 }
  0x3a   :  { %292 = vmatpush1.msra.mxu0 %v70_v52  ;;  %369 = vmatpush1.msra.mxu1 %v72_v53 }
  0x3b   :  { %456 = vmatmul.mubr.msk.f32.gmra.mxu0 %vm106_vm0, %v41_v54  ;;  %458 = vmatmul.mubr.msk.f32.gmra.mxu1 %vm106_vm0, %v41_v54 }
  0x3c   :  { %293 = vmatprep.subr.mxu0 %v63_v55  ;;  %370 = vmatprep.subr.mxu1 %v65_v56 }
  0x3d   :  { %294 = vmatpush1.msra.mxu0 %v62_v57  ;;  %371 = vmatpush1.msra.mxu1 %v64_v58 }
  0x3e   :  { %295 = vmatprep.subr.mxu0 %v55_v59  ;;  %372 = vmatprep.subr.mxu1 %v57_v60 }
  0x3f   :  { %296 = vmatpush1.msra.mxu0 %v54_v61  ;;  %373 = vmatpush1.msra.mxu1 %v56_v62 }
  0x40   :  { %297 = vmatprep.subr.mxu0 %v47_v63  ;;  %374 = vmatprep.subr.mxu1 %v49_v1 }
  0x41   :  { %298 = vmatpush1.msra.mxu0 %v46_v2  ;;  %331 = vmatprep.mubr.f32.mxu0 %v543_v0 }
  0x42   :  { %375 = vmatpush1.msra.mxu1 %v48_v3  ;;  %408 = vmatprep.mubr.f32.mxu1 %v543_v0 }
  0x43   :  { %459 = vmatmul.mubr.msk.f32.vlgmr.msra.gmra.mxu0 %vm106_vm0, %v571_v33  ;;  %461 = vmatmul.mubr.msk.f32.vlgmr.msra.gmra.mxu1 %vm106_vm0, %v571_v33 }
  0x44   :  { %337 = vmatprep.mubr.f32.mxu0 %v543_v0  ;;  %414 = vmatprep.mubr.f32.mxu1 %v543_v0 }
  0x47   :  { %460 = vmatmul.mubr.msk.f32.gmra.mxu0 %vm106_vm0, %v41_v54  ;;  %462 = vmatmul.mubr.msk.f32.gmra.mxu1 %vm106_vm0, %v41_v54 }
  0xef   :  { %v179_v4 = vpop.f32.mrf.mxu0  ;;  %v256_v5 = vpop.f32.mrf.mxu1 }
  0xf0   :  { %421 = vst [vmem:[#allocation7] sm:$0xff] %v179_v4  ;;  %423 = vst [vmem:[#allocation7 + $0x10] sm:$0xff] %v256_v5 }
  0xf1   :  { %v181_v6 = vpop.f32.mrf.mxu0  ;;  %v258_v7 = vpop.f32.mrf.mxu1 }
  0xf2   :  { %422 = vst [vmem:[#allocation7 + $0x8] sm:$0xff] %v181_v6  ;;  %424 = vst [vmem:[#allocation7 + $0x18] sm:$0xff] %v258_v7 }
  0xfb   :  { %v185_v8 = vpop.f32.mrf.mxu0  ;;  %v262_v9 = vpop.f32.mrf.mxu1 }
  0xfc   :  { %429 = vst [vmem:[#allocation7 + $0x40] sm:$0xff] %v185_v8  ;;  %431 = vst [vmem:[#allocation7 + $0x50] sm:$0xff] %v262_v9 }
  0xfd   :  { %v187_v10 = vpop.f32.mrf.mxu0  ;;  %v264_v11 = vpop.f32.mrf.mxu1 }
  0xfe   :  { %430 = vst [vmem:[#allocation7 + $0x48] sm:$0xff] %v187_v10  ;;  %432 = vst [vmem:[#allocation7 + $0x58] sm:$0xff] %v264_v11 }
 0x103   :  { %v333_v0 = vpop.f32.mrf.mxu0  ;;  %v410_v12 = vpop.f32.mrf.mxu1 }
 0x104   :  { %425 = vst [vmem:[#allocation7 + $0x20] sm:$0xff] %v333_v0  ;;  %427 = vst [vmem:[#allocation7 + $0x30] sm:$0xff] %v410_v12 }
 0x105   :  { %v335_v13 = vpop.f32.mrf.mxu0  ;;  %v412_v14 = vpop.f32.mrf.mxu1 }
 0x106   :  { %426 = vst [vmem:[#allocation7 + $0x28] sm:$0xff] %v335_v13  ;;  %428 = vst [vmem:[#allocation7 + $0x38] sm:$0xff] %v412_v14 }
 0x107   :  { %v339_v15 = vpop.f32.mrf.mxu0  ;;  %v416_v16 = vpop.f32.mrf.mxu1 }
 0x108   :  { %433 = vst [vmem:[#allocation7 + $0x60] sm:$0xff] %v339_v15  ;;  %435 = vst [vmem:[#allocation7 + $0x70] sm:$0xff] %v416_v16 }
 0x109   :  { %v341_v17 = vpop.f32.mrf.mxu0  ;;  %v418_v18 = vpop.f32.mrf.mxu1 }
 0x10a   :  { %434 = vst [vmem:[#allocation7 + $0x68] sm:$0xff] %v341_v17  ;;  %436 = vst [vmem:[#allocation7 + $0x78] sm:$0xff] %v418_v18 }
 0x10b   :  { %522 = shalt.err (!%p519_p0)
}
 0x10c   :  { %448 = dma.vmem_to_hbm [thread:$0]  %s443_s1, 2048, %s599_s2, [#allocation4], %s538_s12, %s538_s12, %s539_s13  }
 0x10d   :  { %535 = dma.done.wait [#allocation4], 2048  }
 0x10e   :  { %536 = vsyncadd [#allocation4], 4294965248 }
 0x10f   :  { %452 = vsyncpa [#allocation3], 1 }
 0x110   :  { %453 = vsyncpa [#allocation6], 1 }
 0x111   :  { %454 = vsyncpa [#allocation4], 1 }

</bundles_post_ra>
